<compile_context>
chip_gen: v7x
topology: tpu7x:2x2x1
jax: 0.10.0
libtpu: 0.0.40
codegen_flags: <defaults>
</compile_context>

<pallas_src>
import functools

import jax
import jax.numpy as jnp
from jax.experimental import pallas as pl
from jax.experimental.pallas import tpu as pltpu


def _round_up(x: int, m: int) -> int:
    return ((x + m - 1) // m) * m


def _node_update_kernel(*refs, has_res: bool, apply_dropout: bool,
                        keep_scale: float, threshold: int):
    # refs layout: x, w, b, [res], [bits], out
    idx = 0
    x_ref = refs[idx]; idx += 1
    w_ref = refs[idx]; idx += 1
    b_ref = refs[idx]; idx += 1
    res_ref = None
    if has_res:
        res_ref = refs[idx]; idx += 1
    bits_ref = None
    if apply_dropout:
        bits_ref = refs[idx]; idx += 1
    o_ref = refs[idx]

    # Linear: x @ W + b   (MXU matmul, f32 accumulate)
    h = jnp.dot(x_ref[...], w_ref[...], preferred_element_type=jnp.float32)
    h = h + b_ref[...]                      # bias broadcast over rows
    # ReLU
    h = jnp.maximum(h, 0.0)
    # Dropout (inverted dropout, same semantics as nn.Dropout in train mode).
    # keep iff uniform u >= p  <=>  uint32 bits >= round(p * 2^32).
    if apply_dropout:
        keep = bits_ref[...] >= jnp.uint32(threshold)
        h = jnp.where(keep, h * jnp.float32(keep_scale), 0.0)
    # Residual add (the `if 'res' in node.data` branch)
    if has_res:
        h = h + res_ref[...]
    o_ref[...] = h.astype(o_ref.dtype)


def node_update(ppi_out, weight, bias, res=None, *, dropout_p=0.0,
                training=False, rng_key=None, tm_max=256):
    """Pallas implementation of NodeUpdate.forward.

    ppi_out: [N, in_f] float32
    weight:  [in_f, out_f] float32   (transposed vs torch's [out_f, in_f])
    bias:    [out_f] float32
    res:     optional [N, out_f] float32
    returns: [N, out_f] float32
    """
    N, in_f = ppi_out.shape
    out_f = weight.shape[1]
    has_res = res is not None
    apply_dropout = bool(training) and float(dropout_p) > 0.0

    # Row tile: multiple of 8 sublanes, capped at tm_max, padded grid.
    tm = min(int(tm_max), _round_up(N, 8))
    n_pad = _round_up(N, tm)
    if n_pad != N:
        pad = n_pad - N
        ppi_out = jnp.pad(ppi_out, ((0, pad), (0, 0)))
        if has_res:
            res = jnp.pad(res, ((0, pad), (0, 0)))
    grid = (n_pad // tm,)

    bias2d = bias.reshape(1, out_f)

    inputs = [ppi_out, weight, bias2d]
    in_specs = [
        pl.BlockSpec((tm, in_f), lambda i: (i, 0)),        # row tile, pipelined
        pl.BlockSpec((in_f, out_f), lambda i: (0, 0)),     # weight resident in VMEM
        pl.BlockSpec((1, out_f), lambda i: (0, 0)),        # bias resident in VMEM
    ]
    if has_res:
        inputs.append(res)
        in_specs.append(pl.BlockSpec((tm, out_f), lambda i: (i, 0)))

    threshold = 0
    keep_scale = 1.0
    if apply_dropout:
        if rng_key is None:
            rng_key = jax.random.PRNGKey(0)
        bits = jax.random.bits(rng_key, (n_pad, out_f), dtype=jnp.uint32)
        inputs.append(bits)
        in_specs.append(pl.BlockSpec((tm, out_f), lambda i: (i, 0)))
        threshold = min(int(round(float(dropout_p) * (1 << 32))), (1 << 32) - 1)
        keep_scale = 1.0 / (1.0 - float(dropout_p))

    kernel = functools.partial(
        _node_update_kernel,
        has_res=has_res,
        apply_dropout=apply_dropout,
        keep_scale=float(keep_scale),
        threshold=int(threshold),
    )

    bytes_accessed = 4 * (n_pad * in_f + in_f * out_f + out_f + n_pad * out_f
                          + (n_pad * out_f if has_res else 0)
                          + (n_pad * out_f if apply_dropout else 0))
    cost = pl.CostEstimate(flops=2 * n_pad * in_f * out_f,
                           transcendentals=0,
                           bytes_accessed=bytes_accessed)

    out = pl.pallas_call(
        kernel,
        out_shape=jax.ShapeDtypeStruct((n_pad, out_f), ppi_out.dtype),
        grid=grid,
        in_specs=in_specs,
        out_specs=pl.BlockSpec((tm, out_f), lambda i: (i, 0)),
        compiler_params=pltpu.CompilerParams(
            dimension_semantics=("parallel",)),
        cost_estimate=cost,
    )(*inputs)

    return out[:N] if n_pad != N else out


if __name__ == "__main__":
    key = jax.random.PRNGKey(0)
    k_x, k_w, k_b, k_r, k_drop = jax.random.split(key, 5)

    N, in_f, out_f = 16, 32, 64          # small synthetic graph-node batch
    dropout_p = 0.5

    x = jax.random.normal(k_x, (N, in_f), dtype=jnp.float32)

    # Deterministic Xavier-uniform init for ppi_linear.weight (reset_parameters)
    limit = (6.0 / (in_f + out_f)) ** 0.5
    weight = jax.random.uniform(k_w, (in_f, out_f), jnp.float32,
                                minval=-limit, maxval=limit)
    bias = jax.random.uniform(k_b, (out_f,), jnp.float32,
                              minval=-1.0 / (in_f ** 0.5),
                              maxval=1.0 / (in_f ** 0.5))
    res = jax.random.normal(k_r, (N, out_f), dtype=jnp.float32)

    # --- eval mode, with residual -------------------------------------------
    out = node_update(x, weight, bias, res, dropout_p=dropout_p,
                      training=False)
    out = jax.block_until_ready(out)
    ref = jnp.maximum(x @ weight + bias, 0.0) + res
    assert jnp.allclose(out, ref, atol=1e-5, rtol=1e-5), "mismatch (eval, res)"

    # --- eval mode, no residual (separate kernel variant, no zeros DMA) -----
    out_nr = node_update(x, weight, bias, None, dropout_p=dropout_p,
                         training=False)
    out_nr = jax.block_until_ready(out_nr)
    ref_nr = jnp.maximum(x @ weight + bias, 0.0)
    assert jnp.allclose(out_nr, ref_nr, atol=1e-5, rtol=1e-5), \
        "mismatch (eval, no res)"

    # --- train mode (dropout active), deterministic check -------------------
    out_tr = node_update(x, weight, bias, res, dropout_p=dropout_p,
                         training=True, rng_key=k_drop)
    out_tr = jax.block_until_ready(out_tr)
    bits_ref = jax.random.bits(k_drop, (N, out_f), dtype=jnp.uint32)
    thr = jnp.uint32(min(int(round(dropout_p * (1 << 32))), (1 << 32) - 1))
    keep = bits_ref >= thr
    ref_tr = jnp.where(keep,
                       jnp.maximum(x @ weight + bias, 0.0) / (1.0 - dropout_p),
                       0.0) + res
    assert jnp.allclose(out_tr, ref_tr, atol=1e-5, rtol=1e-5), \
        "mismatch (train, dropout)"

    print("KERNEL_OK")
</pallas_src>

<mosaic_0001>
module attributes {stable_mosaic.version = 11 : i64} {
  func.func @_node_update_kernel(%arg0: i32, %arg1: memref<16x32xf32, #tpu.memory_space<vmem>>, %arg2: memref<32x64xf32, #tpu.memory_space<vmem>>, %arg3: memref<1x64xf32, #tpu.memory_space<vmem>>, %arg4: memref<16x64xf32, #tpu.memory_space<vmem>>, %arg5: memref<16x64xf32, #tpu.memory_space<vmem>>) attributes {dimension_semantics = [#tpu.dimension_semantics<parallel>], iteration_bounds = array<i64: 1>, scalar_prefetch = 0 : i64, scratch_operands = 0 : i64, tpu.core_type = #tpu.core_type<tc>, window_params = [{transform_indices = @transform_0, window_bounds = array<i64: 16, 32>}, {pipeline_mode = #tpu.pipeline_mode<synchronous>, transform_indices = @transform_1, window_bounds = array<i64: 32, 64>}, {pipeline_mode = #tpu.pipeline_mode<synchronous>, transform_indices = @transform_2, window_bounds = array<i64: 1, 64>}, {transform_indices = @transform_3, window_bounds = array<i64: 16, 64>}, {transform_indices = @transform_4, window_bounds = array<i64: 16, 64>}]} {
    %c0 = arith.constant 0 : index
    %c0_0 = arith.constant 0 : index
    %0 = vector.load %arg1[%c0, %c0_0] : memref<16x32xf32, #tpu.memory_space<vmem>>, vector<16x32xf32>
    %c0_1 = arith.constant 0 : index
    %c0_2 = arith.constant 0 : index
    %1 = vector.load %arg2[%c0_1, %c0_2] : memref<32x64xf32, #tpu.memory_space<vmem>>, vector<32x64xf32>
    %cst = arith.constant dense<0.000000e+00> : vector<16x64xf32>
    %2 = tpu.matmul %0, %1, %cst {dimension_numbers = #tpu.dot_dimension_numbers<[1], [0], [0], [1], [0, 0, 1, 1], [], []>} : vector<16x32xf32>, vector<32x64xf32>, vector<16x64xf32> -> vector<16x64xf32>
    %c0_3 = arith.constant 0 : index
    %c0_4 = arith.constant 0 : index
    %3 = vector.load %arg3[%c0_3, %c0_4] : memref<1x64xf32, #tpu.memory_space<vmem>>, vector<1x64xf32>
    %4 = vector.broadcast %3 : vector<1x64xf32> to vector<16x64xf32>
    %5 = arith.addf %2, %4 : vector<16x64xf32>
    %cst_5 = arith.constant 0.000000e+00 : f32
    %6 = vector.broadcast %cst_5 : f32 to vector<16x64xf32>
    %7 = arith.maximumf %5, %6 : vector<16x64xf32>
    %c0_6 = arith.constant 0 : index
    %c0_7 = arith.constant 0 : index
    %8 = vector.load %arg4[%c0_6, %c0_7] : memref<16x64xf32, #tpu.memory_space<vmem>>, vector<16x64xf32>
    %9 = arith.addf %7, %8 : vector<16x64xf32>
    %c0_8 = arith.constant 0 : index
    %c0_9 = arith.constant 0 : index
    %10 = vector.load %arg5[%c0_8, %c0_9] : memref<16x64xf32, #tpu.memory_space<vmem>>, vector<16x64xf32>
    tpu.vector_store %arg5[%c0_8, %c0_9], %9 {strides = array<i32>} : memref<16x64xf32, #tpu.memory_space<vmem>>, vector<16x64xf32>,
    return
  }
  func.func @transform_0(%arg0: i32) -> (i32, i32) {
    %c0_i32 = arith.constant 0 : i32
    %c0_i32_0 = arith.constant 0 : i32
    return %arg0, %c0_i32 : i32, i32
  }
  func.func @transform_1(%arg0: i32) -> (i32, i32) {
    %c0_i32 = arith.constant 0 : i32
    %c0_i32_0 = arith.constant 0 : i32
    %c0_i32_1 = arith.constant 0 : i32
    return %c0_i32, %c0_i32_0 : i32, i32
  }
  func.func @transform_2(%arg0: i32) -> (i32, i32) {
    %c0_i32 = arith.constant 0 : i32
    %c0_i32_0 = arith.constant 0 : i32
    %c0_i32_1 = arith.constant 0 : i32
    return %c0_i32, %c0_i32_0 : i32, i32
  }
  func.func @transform_3(%arg0: i32) -> (i32, i32) {
    %c0_i32 = arith.constant 0 : i32
    %c0_i32_0 = arith.constant 0 : i32
    return %arg0, %c0_i32 : i32, i32
  }
  func.func @transform_4(%arg0: i32) -> (i32, i32) {
    %c0_i32 = arith.constant 0 : i32
    %c0_i32_0 = arith.constant 0 : i32
    return %arg0, %c0_i32 : i32, i32
  }
}

</mosaic_0001>

<bundles_post_ra>
// kernel: tpu_custom_call.1
= control target key start
LH: loop header
LB: loop body
LE: loop exit
PB: predicated region body
PF: predicated region fallthrough
CT: control target
= control target key end

     0   :  { %9 = vsyncpa [#allocation3], 0  ;;  %s410_s0 = inlined_call_operand.hbm [shape: f32[16,32], index: 0, kind: input, shape index: {}]   ;;  %s411_s1 = inlined_call_operand.hbm [shape: f32[32,64], index: 1, kind: input, shape index: {}]   ;;  %s412_s2 = inlined_call_operand.vmem [shape: f32[1,64], index: 2, kind: input, shape index: {}]   ;;  %s413_s3 = inlined_call_operand.hbm [shape: f32[16,64], index: 3, kind: input, shape index: {}]   ;;  %s414_s4 = inlined_call_operand.hbm [shape: f32[16,64], index: 4, kind: output, shape index: {}]  }
   0x1   :  { %10 = vsyncpa [#allocation6], 0 }
   0x2   :  { %11 = vsyncpa [#allocation4], 0  ;;  %s309_s15 = smov [#allocation5]   ;;  %s310_s17 = smov [#allocation2]  }
   0x3   :  { %s29_s16 = sshll.u32 %s309_s15, 4  ;;  %s17_s18 = sshll.u32 %s310_s17, 4  ;;  %s30_s16 = int_to_ptr.vmem [resolvable:$true] %s29_s16  ;;  %s340_s18 = int_to_ptr.vmem [resolvable:$true] %s17_s18 }
   0x4   :  { %s215_s21 = scalar_lea.hbm %s411_s1, 512 }
   0x5   :  { %p216_p0 = scmp.ne.s32.totalorder %s411_s1, %s215_s21  ;;  %p219_p1 = scmp.lt.u32.totalorder %s215_s21, %s411_s1 }
   0x7   :  { %p221_p2 = pnand %p219_p1, %p216_p0 }
   0x9   :  { %224 = shalt.err (!%p221_p2)
}
   0xa   :  { %s225_s26 = scalar_lea.vmem %s30_s16, 512  ;;  %p230_p4 = scmp.lt.s32.totalorder %s30_s16, %s30_s16 }
   0xb   :  { %p226_p3 = scmp.ne.s32.totalorder %s30_s16, %s225_s26  ;;  %p231_p5 = scmp.lt.s32.totalorder %s225_s26, %s225_s26 }
   0xd   :  { %p232_p6 = por %p231_p5, %p230_p4 }
   0xf   :  { %p233_p7 = pnand %p232_p6, %p226_p3 }
  0x11   :  { %236 = shalt.err (!%p233_p7)
}
  0x12   :  { %s311_s27 = smov 128   ;;  %s312_s28 = smov 8  }
  0x13   :  { %35 = dma.hbm_to_vmem [thread:$0]  %s411_s1, 512, %s30_s16, [#allocation6], %s311_s27, %s311_s27, %s312_s28  }
  0x14   :  { %s237_s7 = scalar_lea.hbm %s410_s0, 256 }
  0x15   :  { %p238_p8 = scmp.ne.s32.totalorder %s410_s0, %s237_s7  ;;  %p241_p9 = scmp.lt.u32.totalorder %s237_s7, %s410_s0 }
  0x17   :  { %p243_p10 = pnand %p241_p9, %p238_p8 }
  0x19   :  { %246 = shalt.err (!%p243_p10)
}
  0x1a   :  { %s247_s12 = scalar_lea.vmem %s340_s18, 256  ;;  %p252_p12 = scmp.lt.s32.totalorder %s340_s18, %s340_s18 }
  0x1b   :  { %p248_p11 = scmp.ne.s32.totalorder %s340_s18, %s247_s12  ;;  %p253_p13 = scmp.lt.s32.totalorder %s247_s12, %s247_s12 }
  0x1d   :  { %p254_p0 = por %p253_p13, %p252_p12 }
  0x1f   :  { %p255_p1 = pnand %p254_p0, %p248_p11 }
  0x21   :  { %258 = shalt.err (!%p255_p1)
}
  0x22   :  { %23 = dma.hbm_to_vmem [thread:$0]  %s410_s0, 256, %s340_s18, [#allocation3], %s311_s27, %s311_s27, %s312_s28  }
  0x23   :  { %s313_s14 = smov [#allocation7]   ;;  %s259_s19 = scalar_lea.hbm %s413_s3, 256 }
  0x24   :  { %s43_s15 = sshll.u32 %s313_s14, 4  ;;  %p260_p2 = scmp.ne.s32.totalorder %s413_s3, %s259_s19  ;;  %s44_s15 = int_to_ptr.vmem [resolvable:$true] %s43_s15 }
  0x25   :  { %p263_p3 = scmp.lt.u32.totalorder %s259_s19, %s413_s3 }
  0x27   :  { %p265_p4 = pnand %p263_p3, %p260_p2 }
  0x29   :  { %268 = shalt.err (!%p265_p4)
}
  0x2a   :  { %s269_s24 = scalar_lea.vmem %s44_s15, 256  ;;  %p274_p6 = scmp.lt.s32.totalorder %s44_s15, %s44_s15 }
  0x2b   :  { %p270_p5 = scmp.ne.s32.totalorder %s44_s15, %s269_s24  ;;  %p275_p7 = scmp.lt.s32.totalorder %s269_s24, %s269_s24 }
  0x2d   :  { %p276_p8 = por %p275_p7, %p274_p6 }
  0x2f   :  { %p277_p9 = pnand %p276_p8, %p270_p5 }
  0x31   :  { %280 = shalt.err (!%p277_p9)
}
  0x32   :  { %49 = dma.hbm_to_vmem [thread:$0]  %s413_s3, 256, %s44_s15, [#allocation6], %s311_s27, %s311_s27, %s312_s28  }
  0x33   :  { %303 = dma.done.wait [#allocation3], 256  }
  0x34   :  { %304 = vsyncadd [#allocation3], 4294967040 }
  0x35   :  { %305 = dma.done.wait [#allocation6], 768  }
  0x36   :  { %306 = vsyncadd [#allocation6], 4294966528  ;;  %vm72_vm0 = vcmask 261120   ;;  %v61_v0 = vld [vmem:[#allocation5] sm:$0xff]  ;;  %v62_v1 = vld [vmem:[#allocation5 + $0x8] sm:$0xff]  ;;  %s314_s26 = smov [#allocation8]  }
  0x37   :  { %v63_v2 = vld [vmem:[#allocation5 + $0x10] sm:$0xff]  ;;  %v201_v3 = vpack.c.bf16 %v62_v1, %v61_v0  ;;  %v64_v4 = vld [vmem:[#allocation5 + $0x18] sm:$0xff]  ;;  %v157_v12 = vld [vmem:[#allocation7 + $0x8] sm:$0xff]  ;;  %s168_s29 = sshll.u32 %s314_s26, 4  ;;  %vm160_vm1 = vcmask 523264   ;;  %s169_s29 = int_to_ptr.vmem [resolvable:$true] %s168_s29 }
  0x38   :  { %v59_v5 = vld [vmem:[#allocation2] sm:$0xff]  ;;  %v205_v6 = vpack.c.bf16 %v64_v4, %v63_v2  ;;  %v60_v7 = vld [vmem:[#allocation2 + $0x8] sm:$0xff]  ;;  %v156_v15 = vld [vmem:[#allocation7] sm:$0xff]  ;;  %s281_s30 = scalar_lea.vmem %s169_s29, 256  ;;  %p286_p11 = scmp.lt.s32.totalorder %s169_s29, %s169_s29 }
  0x39   :  { %198 = vmatprep.mubr.msk.f32.mxu0 %vm72_vm0, %v59_v5  ;;  %202 = vmatprep.subr.bf16.mxu0 %v201_v3  ;;  %v181_v8 = vld [vmem:[%s412_s2] ss:$0 sm:$0xff]  ;;  %p282_p10 = scmp.ne.s32.totalorder %s169_s29, %s281_s30  ;;  %p287_p12 = scmp.lt.s32.totalorder %s281_s30, %s281_s30 }
  0x3a   :  { %204 = vmatpush3.bf16.msra.mxu0 %v201_v3 }
  0x3b   :  { %206 = vmatprep.subr.bf16.mxu0 %v205_v6  ;;  %p288_p13 = por %p287_p12, %p286_p11 }
  0x3d   :  { %p289_p0 = pnand %p288_p13, %p282_p10 }
  0x3e   :  { %208 = vmatpush3.bf16.msra.mxu0 %v205_v6 }
  0x41   :  { %199 = vmatmul.mubr.msk.f32.vlgmr.msra.gmra.mrb[0].mxu0 %vm72_vm0, %v60_v7 }
 0x114   :  { %v200_v9 = vpop.f32.mrb[0].mxu0 }
 0x115   :  { %v151_v10 = vadd.f32 %v200_v9, %v181_v8  ;;  %v145_v11 = vpop.f32.mrb[1].mxu0 }
 0x116   :  { %v146_v13 = vadd.f32 %v181_v8, %v145_v11 }
 0x117   :  { %v155_v14 = vmax.f32 %v151_v10, 0.0 }
 0x118   :  { %v154_v16 = vmax.f32 %v146_v13, 0.0 }
 0x119   :  { %v159_v17 = vadd.f32 %v157_v12, %v155_v14 }
 0x11a   :  { %v158_v18 = vadd.f32 %v156_v15, %v154_v16 }
 0x11b   :  { %162 = vst.msk [vmem:[#allocation8 + $0x8] sm:$0xff] %vm160_vm1, %v159_v17 }
 0x11c   :  { %161 = vst.msk [vmem:[#allocation8] sm:$0xff] %vm160_vm1, %v158_v18 }
 0x11d   :  { %292 = shalt.err (!%p289_p0)
}
 0x11e   :  { %s293_s6 = scalar_lea.hbm %s414_s4, 256 }
 0x11f   :  { %p294_p1 = scmp.ne.s32.totalorder %s414_s4, %s293_s6  ;;  %p297_p2 = scmp.lt.u32.totalorder %s293_s6, %s414_s4 }
 0x121   :  { %p299_p3 = pnand %p297_p2, %p294_p1 }
 0x123   :  { %302 = shalt.err (!%p299_p3)
}
 0x124   :  { %174 = dma.vmem_to_hbm [thread:$0]  %s169_s29, 256, %s414_s4, [#allocation4], %s311_s27, %s311_s27, %s312_s28  }
 0x125   :  { %307 = dma.done.wait [#allocation4], 256  }
 0x126   :  { %308 = vsyncadd [#allocation4], 4294967040 }
 0x127   :  { %178 = vsyncpa [#allocation3], 1 }
 0x128   :  { %179 = vsyncpa [#allocation6], 1 }
 0x129   :  { %180 = vsyncpa [#allocation4], 1 }

</bundles_post_ra>
